<compile_context>
chip_gen: v7x
topology: tpu7x:2x2x1
jax: 0.10.0
libtpu: 0.0.40
codegen_flags: <defaults>
</compile_context>

<pallas_src>
import jax
import jax.numpy as jnp
from jax.experimental import pallas as pl
from jax.experimental.pallas import tpu as pltpu


def fused_netsage_kernel(adj_ref, x_ref, w1s_ref, w1n_ref, b1_ref,
                         w2cat_ref, b2_ref, o_ref):
    # Leading batch dim is squeezed by the BlockSpecs -> per-graph views.
    adj = adj_ref[...]      # (N, N) f32 (binary)
    x = x_ref[...]          # (N, F) f32
    C = o_ref.shape[-1]

    # ----- layer 1: h = relu(x @ W1_self + (adj @ x) @ W1_neigh + b1) -----
    agg1 = jnp.dot(adj, x, preferred_element_type=jnp.float32)              # (N, F)
    z1 = (jnp.dot(x, w1s_ref[...], preferred_element_type=jnp.float32)
          + jnp.dot(agg1, w1n_ref[...], preferred_element_type=jnp.float32)
          + b1_ref[...])                                                    # (N, H)
    h = jnp.maximum(z1, 0.0)                                                # stays on-chip

    # ----- layer 2: h @ W2_self + adj @ (h @ W2_neigh) + b2 -----
    # One wide dot against [W2_self | W2_neigh] (H, 2C), then static lane slices.
    y2 = jnp.dot(h, w2cat_ref[...], preferred_element_type=jnp.float32)     # (N, 2C)
    self2 = y2[:, :C]
    hn = y2[:, C:]
    neigh2 = jnp.dot(adj, hn, preferred_element_type=jnp.float32)           # (N, C)
    logits = self2 + neigh2 + b2_ref[...]

    # log_softmax over dim=1 (numerically stable, f32 tail).
    # Note: output is lane-sparse (C=8) — fine at this size; pad to a
    # lane-dense slab only if C / batch grows.
    m = jnp.max(logits, axis=-1, keepdims=True)
    s = logits - m
    lse = jnp.log(jnp.sum(jnp.exp(s), axis=-1, keepdims=True))
    o_ref[...] = (s - lse).astype(o_ref.dtype)


def net_sage_forward_batched(x, adj, params):
    """x: (B, N, F) f32; adj: (B, N, N) f32 (binary). Returns (B, N, C) log-probs."""
    B, N, F = x.shape
    H = params["w1_self"].shape[1]
    C = params["w2_self"].shape[1]

    w1s = params["w1_self"].astype(jnp.float32)                       # (F, H)
    w1n = params["w1_neigh"].astype(jnp.float32)                      # (F, H)
    b1 = params["b1"].reshape(1, H).astype(jnp.float32)
    w2_cat = jnp.concatenate(
        [params["w2_self"], params["w2_neigh"]], axis=1).astype(jnp.float32)  # (H, 2C)
    b2 = params["b2"].reshape(1, C).astype(jnp.float32)

    # Per-graph FLOPs / bytes for the scheduler hint.
    flops_per_graph = (2 * N * N * F          # adj @ x
                       + 2 * N * F * H * 2    # x@W1_self + agg1@W1_neigh
                       + 2 * N * H * (2 * C)  # h @ [W2_self | W2_neigh]
                       + 2 * N * N * C)       # adj @ hn
    bytes_per_graph = 4 * (N * N + N * F + N * C)
    weight_bytes = 4 * (2 * F * H + H * 2 * C + H + C)
    cost = pl.CostEstimate(
        flops=B * flops_per_graph,
        transcendentals=B * N * (C + 1),            # exp + log in log_softmax
        bytes_accessed=B * bytes_per_graph + weight_bytes)

    return pl.pallas_call(
        fused_netsage_kernel,
        out_shape=jax.ShapeDtypeStruct((B, N, C), jnp.float32),
        grid=(B,),
        in_specs=[
            pl.BlockSpec((None, N, N), lambda b: (b, 0, 0)),   # adj  (per graph)
            pl.BlockSpec((None, N, F), lambda b: (b, 0, 0)),   # x    (per graph)
            pl.BlockSpec((F, H), lambda b: (0, 0)),            # W1_self   (resident)
            pl.BlockSpec((F, H), lambda b: (0, 0)),            # W1_neigh  (resident)
            pl.BlockSpec((1, H), lambda b: (0, 0)),            # b1        (resident)
            pl.BlockSpec((H, 2 * C), lambda b: (0, 0)),        # [W2_self | W2_neigh]
            pl.BlockSpec((1, C), lambda b: (0, 0)),            # b2        (resident)
        ],
        out_specs=pl.BlockSpec((None, N, C), lambda b: (b, 0, 0)),
        compiler_params=pltpu.CompilerParams(
            dimension_semantics=("parallel",)),
        cost_estimate=cost,
    )(adj, x, w1s, w1n, b1, w2_cat, b2)


def net_sage_forward(x, adj, params):
    """Single-graph convenience wrapper matching the PyTorch forward signature."""
    return net_sage_forward_batched(x[None], adj[None], params)[0]


def init_params(key, nfeat, nhid, nclass):
    ks = jax.random.split(key, 6)
    scale1 = 1.0 / jnp.sqrt(nfeat)
    scale2 = 1.0 / jnp.sqrt(nhid)
    return {
        "w1_self":  jax.random.uniform(ks[0], (nfeat, nhid), jnp.float32, -scale1, scale1),
        "w1_neigh": jax.random.uniform(ks[1], (nfeat, nhid), jnp.float32, -scale1, scale1),
        "b1":       jax.random.uniform(ks[2], (nhid,),       jnp.float32, -scale1, scale1),
        "w2_self":  jax.random.uniform(ks[3], (nhid, nclass), jnp.float32, -scale2, scale2),
        "w2_neigh": jax.random.uniform(ks[4], (nhid, nclass), jnp.float32, -scale2, scale2),
        "b2":       jax.random.uniform(ks[5], (nclass,),      jnp.float32, -scale2, scale2),
    }


def reference_forward(x, adj, params):
    def sage(x, adj, ws, wn, b):
        return x @ ws + (adj @ x) @ wn + b
    h = jax.nn.relu(sage(x, adj, params["w1_self"], params["w1_neigh"], params["b1"]))
    y = sage(h, adj, params["w2_self"], params["w2_neigh"], params["b2"])
    return jax.nn.log_softmax(y, axis=1)


if __name__ == "__main__":
    B, N, nfeat, nhid, nclass = 8, 64, 32, 32, 8

    key = jax.random.PRNGKey(0)
    k_x, k_adj, k_p = jax.random.split(key, 3)

    x = jax.random.normal(k_x, (B, N, nfeat), jnp.float32)
    # dense binary adjacency (with self-loops), deterministic, per graph
    adj = (jax.random.uniform(k_adj, (B, N, N)) < 0.1).astype(jnp.float32)
    adj = jnp.maximum(adj, jnp.eye(N, dtype=jnp.float32)[None])

    params = init_params(k_p, nfeat, nhid, nclass)

    out = net_sage_forward_batched(x, adj, params)
    out = jax.block_until_ready(out)

    # sanity: shape, prob-space row sums, closeness to f32 reference
    assert out.shape == (B, N, nclass)
    row_sums = jnp.sum(jnp.exp(out), axis=-1)
    assert jnp.allclose(row_sums, 1.0, atol=1e-4)

    ref = jax.vmap(lambda xi, ai: reference_forward(xi, ai, params))(x, adj)
    assert jnp.max(jnp.abs(out - ref)) < 5e-2  # f32 kernel vs f32 reference

    print("KERNEL_OK")
</pallas_src>

<mosaic_0001>
module attributes {stable_mosaic.version = 11 : i64} {
  func.func @fused_netsage_kernel(%arg0: i32, %arg1: memref<1x64x64xf32, #tpu.memory_space<vmem>>, %arg2: memref<1x64x32xf32, #tpu.memory_space<vmem>>, %arg3: memref<32x32xf32, #tpu.memory_space<vmem>>, %arg4: memref<32x32xf32, #tpu.memory_space<vmem>>, %arg5: memref<1x32xf32, #tpu.memory_space<vmem>>, %arg6: memref<32x16xf32, #tpu.memory_space<vmem>>, %arg7: memref<1x8xf32, #tpu.memory_space<vmem>>, %arg8: memref<1x64x8xf32, #tpu.memory_space<vmem>>) attributes {dimension_semantics = [#tpu.dimension_semantics<parallel>], iteration_bounds = array<i64: 8>, scalar_prefetch = 0 : i64, scratch_operands = 0 : i64, tpu.core_type = #tpu.core_type<tc>, window_params = [{transform_indices = @transform_0, window_bounds = array<i64: 1, 64, 64>}, {transform_indices = @transform_1, window_bounds = array<i64: 1, 64, 32>}, {pipeline_mode = #tpu.pipeline_mode<synchronous>, transform_indices = @transform_2, window_bounds = array<i64: 32, 32>}, {pipeline_mode = #tpu.pipeline_mode<synchronous>, transform_indices = @transform_3, window_bounds = array<i64: 32, 32>}, {pipeline_mode = #tpu.pipeline_mode<synchronous>, transform_indices = @transform_4, window_bounds = array<i64: 1, 32>}, {pipeline_mode = #tpu.pipeline_mode<synchronous>, transform_indices = @transform_5, window_bounds = array<i64: 32, 16>}, {pipeline_mode = #tpu.pipeline_mode<synchronous>, transform_indices = @transform_6, window_bounds = array<i64: 1, 8>}, {transform_indices = @transform_7, window_bounds = array<i64: 1, 64, 8>}]} {
    %c0 = arith.constant 0 : index
    %c0_0 = arith.constant 0 : index
    %c0_1 = arith.constant 0 : index
    %0 = vector.load %arg1[%c0, %c0_0, %c0_1] : memref<1x64x64xf32, #tpu.memory_space<vmem>>, vector<1x64x64xf32>
    %1 = vector.shape_cast %0 : vector<1x64x64xf32> to vector<64x64xf32>
    %c0_2 = arith.constant 0 : index
    %c0_3 = arith.constant 0 : index
    %c0_4 = arith.constant 0 : index
    %2 = vector.load %arg2[%c0_2, %c0_3, %c0_4] : memref<1x64x32xf32, #tpu.memory_space<vmem>>, vector<1x64x32xf32>
    %3 = vector.shape_cast %2 : vector<1x64x32xf32> to vector<64x32xf32>
    %cst = arith.constant dense<0.000000e+00> : vector<64x32xf32>
    %4 = tpu.matmul %1, %3, %cst {dimension_numbers = #tpu.dot_dimension_numbers<[1], [0], [0], [1], [0, 0, 1, 1], [], []>} : vector<64x64xf32>, vector<64x32xf32>, vector<64x32xf32> -> vector<64x32xf32>
    %c0_5 = arith.constant 0 : index
    %c0_6 = arith.constant 0 : index
    %5 = vector.load %arg3[%c0_5, %c0_6] : memref<32x32xf32, #tpu.memory_space<vmem>>, vector<32x32xf32>
    %cst_7 = arith.constant dense<0.000000e+00> : vector<64x32xf32>
    %6 = tpu.matmul %3, %5, %cst_7 {dimension_numbers = #tpu.dot_dimension_numbers<[1], [0], [0], [1], [0, 0, 1, 1], [], []>} : vector<64x32xf32>, vector<32x32xf32>, vector<64x32xf32> -> vector<64x32xf32>
    %c0_8 = arith.constant 0 : index
    %c0_9 = arith.constant 0 : index
    %7 = vector.load %arg4[%c0_8, %c0_9] : memref<32x32xf32, #tpu.memory_space<vmem>>, vector<32x32xf32>
    %cst_10 = arith.constant dense<0.000000e+00> : vector<64x32xf32>
    %8 = tpu.matmul %4, %7, %cst_10 {dimension_numbers = #tpu.dot_dimension_numbers<[1], [0], [0], [1], [0, 0, 1, 1], [], []>} : vector<64x32xf32>, vector<32x32xf32>, vector<64x32xf32> -> vector<64x32xf32>
    %9 = arith.addf %6, %8 : vector<64x32xf32>
    %c0_11 = arith.constant 0 : index
    %c0_12 = arith.constant 0 : index
    %10 = vector.load %arg5[%c0_11, %c0_12] : memref<1x32xf32, #tpu.memory_space<vmem>>, vector<1x32xf32>
    %11 = vector.broadcast %10 : vector<1x32xf32> to vector<64x32xf32>
    %12 = arith.addf %9, %11 : vector<64x32xf32>
    %cst_13 = arith.constant 0.000000e+00 : f32
    %13 = vector.broadcast %cst_13 : f32 to vector<64x32xf32>
    %14 = arith.maximumf %12, %13 : vector<64x32xf32>
    %c0_14 = arith.constant 0 : index
    %c0_15 = arith.constant 0 : index
    %15 = vector.load %arg6[%c0_14, %c0_15] : memref<32x16xf32, #tpu.memory_space<vmem>>, vector<32x16xf32>
    %cst_16 = arith.constant dense<0.000000e+00> : vector<64x16xf32>
    %16 = tpu.matmul %14, %15, %cst_16 {dimension_numbers = #tpu.dot_dimension_numbers<[1], [0], [0], [1], [0, 0, 1, 1], [], []>} : vector<64x32xf32>, vector<32x16xf32>, vector<64x16xf32> -> vector<64x16xf32>
    %17 = vector.extract_strided_slice %16 {offsets = [0, 0], sizes = [64, 8], strides = [1, 1]} : vector<64x16xf32> to vector<64x8xf32>
    %18 = vector.extract_strided_slice %16 {offsets = [0, 8], sizes = [64, 8], strides = [1, 1]} : vector<64x16xf32> to vector<64x8xf32>
    %cst_17 = arith.constant dense<0.000000e+00> : vector<64x8xf32>
    %19 = tpu.matmul %1, %18, %cst_17 {dimension_numbers = #tpu.dot_dimension_numbers<[1], [0], [0], [1], [0, 0, 1, 1], [], []>} : vector<64x64xf32>, vector<64x8xf32>, vector<64x8xf32> -> vector<64x8xf32>
    %20 = arith.addf %17, %19 : vector<64x8xf32>
    %c0_18 = arith.constant 0 : index
    %c0_19 = arith.constant 0 : index
    %21 = vector.load %arg7[%c0_18, %c0_19] : memref<1x8xf32, #tpu.memory_space<vmem>>, vector<1x8xf32>
    %22 = vector.broadcast %21 : vector<1x8xf32> to vector<64x8xf32>
    %23 = arith.addf %20, %22 : vector<64x8xf32>
    %cst_20 = arith.constant dense<0xFF800000> : vector<64xf32>
    %24 = vector.multi_reduction <maximumf>, %23, %cst_20 [1] : vector<64x8xf32> to vector<64xf32>
    %25 = vector.shape_cast %24 : vector<64xf32> to vector<64x1xf32>
    %26 = vector.broadcast %25 : vector<64x1xf32> to vector<64x8xf32>
    %27 = arith.subf %23, %26 : vector<64x8xf32>
    %28 = math.exp %27 : vector<64x8xf32>
    %cst_21 = arith.constant dense<0.000000e+00> : vector<64xf32>
    %29 = vector.multi_reduction <add>, %28, %cst_21 [1] : vector<64x8xf32> to vector<64xf32>
    %30 = vector.shape_cast %29 : vector<64xf32> to vector<64x1xf32>
    %31 = math.log %30 : vector<64x1xf32>
    %32 = vector.broadcast %31 : vector<64x1xf32> to vector<64x8xf32>
    %33 = arith.subf %27, %32 : vector<64x8xf32>
    %c0_22 = arith.constant 0 : index
    %c0_23 = arith.constant 0 : index
    %c0_24 = arith.constant 0 : index
    %34 = vector.load %arg8[%c0_22, %c0_23, %c0_24] : memref<1x64x8xf32, #tpu.memory_space<vmem>>, vector<1x64x8xf32>
    %35 = vector.shape_cast %34 : vector<1x64x8xf32> to vector<64x8xf32>
    %36 = vector.shape_cast %33 : vector<64x8xf32> to vector<1x64x8xf32>
    tpu.vector_store %arg8[%c0_22, %c0_23, %c0_24], %36 {strides = array<i32>} : memref<1x64x8xf32, #tpu.memory_space<vmem>>, vector<1x64x8xf32>,
    return
  }
  func.func @transform_0(%arg0: i32) -> (i32, i32, i32) {
    %c0_i32 = arith.constant 0 : i32
    %c0_i32_0 = arith.constant 0 : i32
    %c0_i32_1 = arith.constant 0 : i32
    return %arg0, %c0_i32, %c0_i32_0 : i32, i32, i32
  }
  func.func @transform_1(%arg0: i32) -> (i32, i32, i32) {
    %c0_i32 = arith.constant 0 : i32
    %c0_i32_0 = arith.constant 0 : i32
    %c0_i32_1 = arith.constant 0 : i32
    return %arg0, %c0_i32, %c0_i32_0 : i32, i32, i32
  }
  func.func @transform_2(%arg0: i32) -> (i32, i32) {
    %c0_i32 = arith.constant 0 : i32
    %c0_i32_0 = arith.constant 0 : i32
    %c0_i32_1 = arith.constant 0 : i32
    return %c0_i32, %c0_i32_0 : i32, i32
  }
  func.func @transform_3(%arg0: i32) -> (i32, i32) {
    %c0_i32 = arith.constant 0 : i32
    %c0_i32_0 = arith.constant 0 : i32
    %c0_i32_1 = arith.constant 0 : i32
    return %c0_i32, %c0_i32_0 : i32, i32
  }
  func.func @transform_4(%arg0: i32) -> (i32, i32) {
    %c0_i32 = arith.constant 0 : i32
    %c0_i32_0 = arith.constant 0 : i32
    %c0_i32_1 = arith.constant 0 : i32
    return %c0_i32, %c0_i32_0 : i32, i32
  }
  func.func @transform_5(%arg0: i32) -> (i32, i32) {
    %c0_i32 = arith.constant 0 : i32
    %c0_i32_0 = arith.constant 0 : i32
    %c0_i32_1 = arith.constant 0 : i32
    return %c0_i32, %c0_i32_0 : i32, i32
  }
  func.func @transform_6(%arg0: i32) -> (i32, i32) {
    %c0_i32 = arith.constant 0 : i32
    %c0_i32_0 = arith.constant 0 : i32
    %c0_i32_1 = arith.constant 0 : i32
    return %c0_i32, %c0_i32_0 : i32, i32
  }
  func.func @transform_7(%arg0: i32) -> (i32, i32, i32) {
    %c0_i32 = arith.constant 0 : i32
    %c0_i32_0 = arith.constant 0 : i32
    %c0_i32_1 = arith.constant 0 : i32
    return %arg0, %c0_i32, %c0_i32_0 : i32, i32, i32
  }
}

</mosaic_0001>

<bundles_post_ra>
// kernel: tpu_custom_call.1
= control target key start
LH: loop header
LB: loop body
LE: loop exit
PB: predicated region body
PF: predicated region fallthrough
CT: control target
= control target key end

     0   :  { %s1624_s24 = smov 0   ;;  %s1879_s0 = inlined_call_operand.vmem [shape: f32[8,64,64], index: 0, kind: input, shape index: {}]   ;;  %s1880_s1 = inlined_call_operand.vmem [shape: f32[8,64,32], index: 1, kind: input, shape index: {}]   ;;  %s1881_s2 = inlined_call_operand.vmem [shape: f32[32,32], index: 2, kind: input, shape index: {}]   ;;  %s1882_s3 = inlined_call_operand.vmem [shape: f32[32,32], index: 3, kind: input, shape index: {}]   ;;  %s1883_s4 = inlined_call_operand.vmem [shape: f32[1,32], index: 4, kind: input, shape index: {}]   ;;  %s1884_s5 = inlined_call_operand.vmem [shape: f32[32,16], index: 5, kind: input, shape index: {}]   ;;  %s1885_s6 = inlined_call_operand.vmem [shape: f32[1,8], index: 6, kind: input, shape index: {}]   ;;  %s1886_s7 = inlined_call_operand.vmem [shape: f32[8,64,8], index: 7, kind: output, shape index: {}]  }
   0x1 LB: > { %s1200_s25 = sadd.s32 4294967295, %s1581_s24   ;;  %p1204_p0 = scmp.ge.s32.totalorder %s1581_s24, 1  ;;  %s1581_s24 = sphi %s1624_s24, %s17_s24  }
   0x2   : > { %p247_p1 = scmp.lt.s32.totalorder %s1581_s24, 9 }
   0x4   : > { %p248_p2 = pnand %p1204_p0, %p247_p1 }
   0x5   : > { %p284_p3 = scmp.lt.s32.totalorder (!%p248_p2), %s1200_s25, 7  ;;  %v449_v0 = vld [vmem:[%s1882_s3] sm:$0xff] (!%p248_p2)  ;;  %v450_v1 = vld [vmem:[%s1882_s3 + $0x8] sm:$0xff] (!%p248_p2)  ;;  %v451_v2 = vld [vmem:[%s1882_s3 + $0x10] sm:$0xff] (!%p248_p2)  ;;  %vm315_vm0 = vcmask (!%p248_p2), 523264   ;;  %vm453_vm1 = vcmask (!%p248_p2), 261120  }
   0x6   : > { %251 = sbr.rel (%p248_p2) target bundleno = 1383 (0x567), region = 48  ;;  %v1458_v3 = vpack.c.bf16 (!%p248_p2), %v450_v1, %v449_v0  ;;  %v452_v4 = vld [vmem:[%s1882_s3 + $0x18] sm:$0xff] (!%p248_p2)  ;;  %v445_v26 = vld [vmem:[%s1881_s2] sm:$0xff] (!%p248_p2)  ;;  %v446_v27 = vld [vmem:[%s1881_s2 + $0x8] sm:$0xff] (!%p248_p2)  ;;  %s1583_s15 = smov (!%p248_p2), 120   ;;  %vm1028_vm2 = vcmask (!%p248_p2), 64512  }
   0x7   : > { %v1462_v5 = vpack.c.bf16 (!%p248_p2), %v452_v4, %v451_v2  ;;  %v1466_v28 = vpack.c.bf16 (!%p248_p2), %v446_v27, %v445_v26  ;;  %v735_v29 = vld [vmem:[%s1884_s5] sm:$0xff] (!%p248_p2)  ;;  %v736_v30 = vld [vmem:[%s1884_s5 + $0x8] sm:$0xff] (!%p248_p2)  ;;  %v737_v31 = vld [vmem:[%s1884_s5 + $0x10] sm:$0xff] (!%p248_p2) }
   0x8   : > { %1459 = vmatprep.subr.bf16.mxu1 (!%p248_p2), %v1458_v3  ;;  %v1474_v32 = vpack.c.bf16 (!%p248_p2), %v736_v30, %v735_v29  ;;  %v738_v33 = vld [vmem:[%s1884_s5 + $0x18] sm:$0xff] (!%p248_p2)  ;;  %v447_v35 = vld [vmem:[%s1881_s2 + $0x10] sm:$0xff] (!%p248_p2)  ;;  %v1235_v46 = vld [vmem:[%s1883_s4] ss:$0 sm:$0xff] (!%p248_p2) }
   0x9   : > { %1461 = vmatpush3.bf16.msra.mxu1 (!%p248_p2), %v1458_v3  ;;  %v1478_v34 = vpack.c.bf16 (!%p248_p2), %v738_v33, %v737_v31  ;;  %v448_v36 = vld [vmem:[%s1881_s2 + $0x18] sm:$0xff] (!%p248_p2) }
   0xa   : > { %1463 = vmatprep.subr.bf16.mxu1 (!%p248_p2), %v1462_v5  ;;  %v1470_v39 = vpack.c.bf16 (!%p248_p2), %v448_v36, %v447_v35 }
   0xd   : > { %s1888_s25 = smov (!%p284_p3, %s1200_s25), 7  ;;  %1465 = vmatpush3.bf16.msra.mxu1 %v1462_v5 }
   0xe   : > { %s1644_s11 = sshll.u32 %s1888_s25, 6  ;;  %1467 = vmatprep.subr.bf16.mxu1 %v1466_v28 }
   0xf   : > { %s293_s14 = scalar_lea.vmem %s1880_s1, %s1644_s11  ;;  %s1660_s17 = scalar_lea.vmem %s1879_s0, %s1644_s11 }
  0x10   : > { %v1650_v6 = vld [vmem:[%s293_s14] sm:$0xff]  ;;  %v1652_v7 = vld [vmem:[%s293_s14 + $0x8] sm:$0xff]  ;;  %v1654_v8 = vld [vmem:[%s293_s14 + $0x10] sm:$0xff]  ;;  %s1850_s20 = scalar_lea.vmem %s1886_s7, %s1644_s11 }
  0x11   : > { %v1442_v9 = vpack.c.bf16 %v1652_v7, %v1650_v6  ;;  %v1664_v10 = vld [vmem:[%s293_s14 + $0x18] sm:$0xff]  ;;  %v1668_v12 = vld [vmem:[%s293_s14 + $0x20] sm:$0xff]  ;;  %v1670_v13 = vld [vmem:[%s293_s14 + $0x28] sm:$0xff] }
  0x12   : > { %v1446_v11 = vpack.c.bf16 %v1664_v10, %v1654_v8  ;;  %v1673_v14 = vld [vmem:[%s1660_s17] sm:$0xff]  ;;  %v1450_v15 = vpack.c.bf16 %v1670_v13, %v1668_v12  ;;  %v1679_v16 = vld [vmem:[%s293_s14 + $0x30] sm:$0xff]  ;;  %v1681_v17 = vld [vmem:[%s293_s14 + $0x38] sm:$0xff] }
  0x13   : > { %1443 = vmatprep.subr.bf16.mxu0 %v1442_v9  ;;  %1342 = vmatprep.mubr.msk.f32.mxu0 %vm315_vm0, %v1673_v14  ;;  %v1454_v18 = vpack.c.bf16 %v1681_v17, %v1679_v16  ;;  %v1686_v19 = vld [vmem:[%s1660_s17 + $0x8] sm:$0xff]  ;;  %v301_v20 = vld [vmem:[%s1660_s17 + $0x10] sm:$0xff]  ;;  %v1693_v21 = vld [vmem:[%s1660_s17 + $0x18] sm:$0xff] }
  0x14   : > { %1445 = vmatpush3.bf16.msra.mxu0 %v1442_v9  ;;  %v1696_v22 = vld [vmem:[%s1660_s17 + $0x20] sm:$0xff]  ;;  %v1703_v23 = vld [vmem:[%s1660_s17 + $0x28] sm:$0xff]  ;;  %v1706_v24 = vld [vmem:[%s1660_s17 + $0x30] sm:$0xff] }
  0x15   : > { %1447 = vmatprep.subr.bf16.mxu0 %v1446_v11  ;;  %v1713_v25 = vld [vmem:[%s1660_s17 + $0x38] sm:$0xff] }
  0x18   : > { %1449 = vmatpush3.bf16.msra.mxu0 %v1446_v11 }
  0x19   : > { %1451 = vmatprep.subr.bf16.mxu0 %v1450_v15 }
  0x1c   : > { %1453 = vmatpush3.bf16.msra.mxu0 %v1450_v15 }
  0x1d   : > { %1455 = vmatprep.subr.bf16.mxu0 %v1454_v18 }
  0x20   : > { %1457 = vmatpush3.bf16.msra.mxu0 %v1454_v18 }
  0x21   : > { %1475 = vmatprep.subr.bf16.mxu0 %v1474_v32 }
  0x23   : > { %1343 = vmatmul.mubr.msk.f32.vlgmr.msra.gmra.mrb[0].mxu0 %vm315_vm0, %v1686_v19 }
  0x24   : > { %1345 = vmatprep.mubr.msk.f32.mxu0 %vm315_vm0, %v301_v20  ;;  %1477 = vmatpush3.bf16.msra.mxu0 %v1474_v32 }
  0x25   : > { %1479 = vmatprep.subr.bf16.mxu0 %v1478_v34 }
  0x27   : > { %1346 = vmatmul.mubr.msk.f32.gmra.mrb[2].mxu0 %vm315_vm0, %v1693_v21 }
  0x28   : > { %1348 = vmatprep.mubr.msk.f32.mxu0 %vm315_vm0, %v1696_v22  ;;  %1481 = vmatpush3.bf16.msra.mxu0 %v1478_v34 }
  0x2b   : > { %1349 = vmatmul.mubr.msk.f32.gmra.mrb[4].mxu0 %vm315_vm0, %v1703_v23 }
  0x2c   : > { %1351 = vmatprep.mubr.msk.f32.mxu0 %vm315_vm0, %v1706_v24 }
  0x2f   : > { %1352 = vmatmul.mubr.msk.f32.gmra.mrb[6].mxu0 %vm315_vm0, %v1713_v25 }
  0xf6   : > { %v1344_v37 = vpop.f32.mrb[0].mxu0 }
  0xf7   : > { %v406_v38 = vpop.f32.mrb[1].mxu0 }
  0xf8   : > { %1362 = vmatprep.mubr.msk.f32.mxu1 %vm453_vm1, %v406_v38 }
  0xf9   : > { %1363 = vmatmul.mubr.msk.f32.vlgmr.msra.gmra.mrb[0].mxu1 %vm453_vm1, %v1344_v37 }
  0xfa   : > { %v1347_v40 = vpop.f32.mrb[2].mxu0  ;;  %1469 = vmatpush3.bf16.msra.mxu1 %v1466_v28 }
  0xfb   : > { %v416_v41 = vpop.f32.mrb[3].mxu0  ;;  %1471 = vmatprep.subr.bf16.mxu1 %v1470_v39 }
  0xfc   : > { %1365 = vmatprep.mubr.msk.f32.mxu1 %vm453_vm1, %v416_v41 }
  0xfd   : > { %1366 = vmatmul.mubr.msk.f32.gmra.mrb[2].mxu1 %vm453_vm1, %v1347_v40 }
  0xfe   : > { %v1350_v42 = vpop.f32.mrb[4].mxu0  ;;  %1473 = vmatpush3.bf16.msra.mxu1 %v1470_v39 }
  0xff   : > { %v426_v43 = vpop.f32.mrb[5].mxu0 }
 0x100   : > { %1368 = vmatprep.mubr.msk.f32.mxu1 %vm453_vm1, %v426_v43 }
 0x101   : > { %1369 = vmatmul.mubr.msk.f32.gmra.mrb[4].mxu1 %vm453_vm1, %v1350_v42 }
 0x102   : > { %v1353_v44 = vpop.f32.mrb[6].mxu0 }
 0x103   : > { %v436_v45 = vpop.f32.mrb[7].mxu0 }
 0x104   : > { %1371 = vmatprep.mubr.msk.f32.mxu1 %vm453_vm1, %v436_v45 }
 0x105   : > { %1372 = vmatmul.mubr.msk.f32.gmra.mrb[6].mxu1 %vm453_vm1, %v1353_v44 }
 0x106   : > { %1382 = vmatprep.mubr.msk.f32.mxu1 %vm453_vm1, %v1650_v6 }
 0x109   : > { %1383 = vmatmul.mubr.msk.f32.vlgmr.msra.gmra.mrb[0].mxu1 %vm453_vm1, %v1652_v7 }
 0x10a   : > { %1385 = vmatprep.mubr.msk.f32.mxu1 %vm453_vm1, %v1654_v8 }
 0x10d   : > { %1386 = vmatmul.mubr.msk.f32.gmra.mrb[2].mxu1 %vm453_vm1, %v1664_v10 }
 0x10e   : > { %1388 = vmatprep.mubr.msk.f32.mxu1 %vm453_vm1, %v1668_v12 }
 0x111   : > { %1389 = vmatmul.mubr.msk.f32.gmra.mrb[4].mxu1 %vm453_vm1, %v1670_v13 }
 0x112   : > { %1391 = vmatprep.mubr.msk.f32.mxu1 %vm453_vm1, %v1679_v16 }
 0x115   : > { %1392 = vmatmul.mubr.msk.f32.gmra.mrb[6].mxu1 %vm453_vm1, %v1681_v17 }
 0x116   : > { %1433 = vmatprep.mubr.msk.f32.mxu1 %vm315_vm0, %v301_v20 }
 0x1dc   : > { %v1384_v47 = vpop.f32.mrb[0].mxu1 }
 0x1dd   : > { %v720_v48 = vadd.f32 %v1384_v47, %v1235_v46  ;;  %v673_v49 = vpop.f32.mrb[1].mxu1 }
 0x1de   : > { %v719_v50 = vadd.f32 %v1235_v46, %v673_v49 }
 0x1df   : > { %v728_v53 = vmax.f32 %v720_v48, 0.0 }
 0x1e0   : > { %v727_v51 = vmax.f32 %v719_v50, 0.0  ;;  %v1387_v52 = vpop.f32.mrb[2].mxu1 }
 0x1e1   : > { %v722_v54 = vadd.f32 %v1387_v52, %v1235_v46  ;;  %v683_v55 = vpop.f32.mrb[3].mxu1 }
 0x1e2   : > { %v721_v56 = vadd.f32 %v1235_v46, %v683_v55  ;;  %1402 = vmatprep.mubr.msk.f32.mxu0 %vm453_vm1, %v727_v51 }
 0x1e3   : > { %1403 = vmatmul.mubr.msk.f32.vlgmr.msra.gmra.mrb[8].mxu0 %vm453_vm1, %v728_v53  ;;  %v730_v59 = vmax.f32 %v722_v54, 0.0 }
 0x1e4   : > { %v729_v57 = vmax.f32 %v721_v56, 0.0  ;;  %v1390_v58 = vpop.f32.mrb[4].mxu1 }
 0x1e5   : > { %v724_v60 = vadd.f32 %v1390_v58, %v1235_v46  ;;  %v693_v61 = vpop.f32.mrb[5].mxu1 }
 0x1e6   : > { %v723_v62 = vadd.f32 %v1235_v46, %v693_v61  ;;  %1405 = vmatprep.mubr.msk.f32.mxu0 %vm453_vm1, %v729_v57 }
 0x1e7   : > { %1406 = vmatmul.mubr.msk.f32.gmra.mrb[10].mxu0 %vm453_vm1, %v730_v59  ;;  %v732_v1 = vmax.f32 %v724_v60, 0.0 }
 0x1e8   : > { %v731_v63 = vmax.f32 %v723_v62, 0.0  ;;  %v1393_v0 = vpop.f32.mrb[6].mxu1 }
 0x1e9   : > { %v726_v2 = vadd.f32 %v1393_v0, %v1235_v46  ;;  %v703_v3 = vpop.f32.mrb[7].mxu1 }
 0x1ea   : > { %v725_v4 = vadd.f32 %v1235_v46, %v703_v3  ;;  %1408 = vmatprep.mubr.msk.f32.mxu0 %vm453_vm1, %v731_v63 }
 0x1eb   : > { %1409 = vmatmul.mubr.msk.f32.gmra.mrb[12].mxu0 %vm453_vm1, %v732_v1  ;;  %v734_v6 = vmax.f32 %v726_v2, 0.0 }
 0x1ec   : > { %v733_v5 = vmax.f32 %v725_v4, 0.0 }
 0x1ee   : > { %1411 = vmatprep.mubr.msk.f32.mxu0 %vm453_vm1, %v733_v5 }
 0x1ef   : > { %1412 = vmatmul.mubr.msk.f32.gmra.mrb[14].mxu0 %vm453_vm1, %v734_v6 }
 0x1f0   : > { %1430 = vmatprep.mubr.msk.f32.mxu0 %vm315_vm0, %v1673_v14 }
 0x2b6   : > { %v1404_v7 = vpop.f32.mrb[8].mxu0 }
 0x2b7   : > { %v829_v8 = vpop.f32.mrb[9].mxu0 }
 0x2b8   : > { %v1523_v9 = vpack.i.bf16 %v1404_v7, %v829_v8 }
 0x2ba   : > { %1524 = vrot.lane.b32.xlu0 %v1523_v9, %s1583_s15  ;;  %v1407_v10 = vpop.f32.mrb[10].mxu0 }
 0x2bb   : > { %v839_v11 = vpop.f32.mrb[11].mxu0 }
 0x2bc   : > { %v1528_v12 = vpack.i.bf16 %v1407_v10, %v839_v11 }
 0x2be   : > { %1529 = vrot.lane.b32.xlu0 %v1528_v12, %s1583_s15  ;;  %v1410_v13 = vpop.f32.mrb[12].mxu0 }
 0x2bf   : > { %v1779_v15 = vpop.f32.mrb[13].mxu0 }
 0x2c0   : > { %v1533_v16 = vpack.i.bf16 %v1410_v13, %v1779_v15 }
 0x2c2   : > { %1534 = vrot.lane.b32.xlu1 %v1533_v16, %s1583_s15  ;;  %v1782_v17 = vpop.f32.mrb[14].mxu0 }
 0x2c3   : > { %v1784_v18 = vpop.f32.mrb[15].mxu0 }
 0x2c4   : > { %v1538_v14 = vpack.i.bf16 %v1782_v17, %v1784_v18 }
 0x2c6   : > { %1539 = vrot.lane.b32.xlu1 %v1538_v14, %s1583_s15 }
 0x32c   : > { %v1525_v20 = vpop.permute.xlu0 %1524 }
 0x32d   : > { %v1527_v26 = vunpack.i.h.bf16 %v1525_v20  ;;  %v1526_v27 = vunpack.i.l.bf16 %v1525_v20 }
 0x32f   : > { %v1482_v28 = vpack.c.bf16 %v1527_v26, %v1526_v27 }
 0x330   : > { %v1530_v29 = vpop.permute.xlu0 %1529 }
 0x331   : > { %v1532_v30 = vunpack.i.h.bf16 %v1530_v29  ;;  %v1531_v31 = vunpack.i.l.bf16 %v1530_v29  ;;  %1483 = vmatprep.subr.bf16.mxu0 %v1482_v28  ;;  %1498 = vmatprep.subr.bf16.mxu1 %v1482_v28 }
 0x332   : > { %1485 = vmatpush3.bf16.msra.mxu0 %v1482_v28  ;;  %1502 = vmatpush3.bf16.msra.mxu1 %v1482_v28 }
 0x333   : > { %v1486_v32 = vpack.c.bf16 %v1532_v30, %v1531_v31 }
 0x334   : > { %v1535_v33 = vpop.permute.xlu1 %1534 }
 0x335   : > { %v1537_v34 = vunpack.i.h.bf16 %v1535_v33  ;;  %v1536_v35 = vunpack.i.l.bf16 %v1535_v33  ;;  %1487 = vmatprep.subr.bf16.mxu0 %v1486_v32  ;;  %1499 = vmatprep.subr.bf16.mxu1 %v1486_v32 }
 0x336   : > { %1489 = vmatpush3.bf16.msra.mxu0 %v1486_v32  ;;  %1503 = vmatpush3.bf16.msra.mxu1 %v1486_v32 }
 0x337   : > { %v1490_v36 = vpack.c.bf16 %v1537_v34, %v1536_v35 }
 0x338   : > { %v1540_v37 = vpop.permute.xlu1 %1539 }
 0x339   : > { %v1542_v38 = vunpack.i.h.bf16 %v1540_v37  ;;  %v1541_v39 = vunpack.i.l.bf16 %v1540_v37  ;;  %1491 = vmatprep.subr.bf16.mxu0 %v1490_v36  ;;  %1500 = vmatprep.subr.bf16.mxu1 %v1490_v36 }
 0x33a   : > { %1493 = vmatpush3.bf16.msra.mxu0 %v1490_v36  ;;  %1504 = vmatpush3.bf16.msra.mxu1 %v1490_v36 }
 0x33b   : > { %v1494_v40 = vpack.c.bf16 %v1542_v38, %v1541_v39 }
 0x33d   : > { %1495 = vmatprep.subr.bf16.mxu0 %v1494_v40  ;;  %1501 = vmatprep.subr.bf16.mxu1 %v1494_v40 }
 0x33e   : > { %1497 = vmatpush3.bf16.msra.mxu0 %v1494_v40  ;;  %1505 = vmatpush3.bf16.msra.mxu1 %v1494_v40 }
 0x341   : > { %1431 = vmatmul.mubr.msk.f32.vlgmr.msra.gmra.mrb[16].mxu0 %vm315_vm0, %v1686_v19  ;;  %1434 = vmatmul.mubr.msk.f32.vlgmr.msra.gmra.mrb[8].mxu1 %vm315_vm0, %v1693_v21  ;;  %v1252_v19 = vld [vmem:[%s1885_s6] ss:$0 sm:$0xff] }
 0x342   : > { %1436 = vmatprep.mubr.msk.f32.mxu1 %vm315_vm0, %v1696_v22 }
 0x345   : > { %1437 = vmatmul.mubr.msk.f32.gmra.mrb[10].mxu1 %vm315_vm0, %v1703_v23 }
 0x346   : > { %1439 = vmatprep.mubr.msk.f32.mxu1 %vm315_vm0, %v1706_v24 }
 0x349   : > { %1440 = vmatmul.mubr.msk.f32.gmra.mrb[12].mxu1 %vm315_vm0, %v1713_v25 }
 0x414   : > { %v1432_v41 = vpop.f32.mrb[16].mxu0  ;;  %v1435_v42 = vpop.f32.mrb[8].mxu1 }
 0x415   : > { %v1006_v43 = vadd.f32 %v1432_v41, %v1404_v7  ;;  %v1008_v21 = vadd.f32 %v1435_v42, %v1407_v10  ;;  %v966_v44 = vpop.f32.mrb[17].mxu0  ;;  %v976_v45 = vpop.f32.mrb[9].mxu1 }
 0x416   : > { %v1005_v22 = vadd.f32 %v966_v44, %v829_v8  ;;  %v1007_v46 = vadd.f32 %v976_v45, %v839_v11 }
 0x417   : > { %v1023_v23 = vadd.f32 %v1252_v19, %v1008_v21  ;;  %v1021_v47 = vadd.f32 %v1252_v19, %v1006_v43 }
 0x418   : > { %v1438_v48 = vpop.f32.mrb[10].mxu1  ;;  %v1020_v51 = vadd.f32 %v1252_v19, %v1005_v22  ;;  %v1022_v58 = vadd.f32 %v1252_v19, %v1007_v46 }
 0x419   : > { %v1010_v24 = vadd.f32 %v1438_v48, %v1410_v13  ;;  %v986_v49 = vpop.f32.mrb[11].mxu1  ;;  %v1038_v25 = vsel %vm1028_vm2, %v1023_v23, -inf  ;;  %v1032_v50 = vsel %vm1028_vm2, %v1021_v47, -inf }
 0x41a   : > { %v1009_v52 = vadd.f32 %v986_v49, %v1779_v15  ;;  %1039 = vmax.xlane.f32.xlu0 %v1038_v25  ;;  %1033 = vmax.xlane.f32.xlu1 %v1032_v50  ;;  %v1029_v57 = vsel %vm1028_vm2, %v1020_v51, -inf  ;;  %v1035_v62 = vsel %vm1028_vm2, %v1022_v58, -inf }
 0x41b   : > { %v1025_v63 = vadd.f32 %v1252_v19, %v1010_v24 }
 0x41c   : > { %v1441_v53 = vpop.f32.mrb[12].mxu1  ;;  %v1024_v54 = vadd.f32 %v1252_v19, %v1009_v52 }
 0x41d   : > { %v1012_v55 = vadd.f32 %v1441_v53, %v1782_v17  ;;  %v996_v56 = vpop.f32.mrb[13].mxu1  ;;  %v1044_v1 = vsel %vm1028_vm2, %v1025_v63, -inf }
 0x41e   : > { %v1011_v59 = vadd.f32 %v996_v56, %v1784_v18  ;;  %1030 = vmax.xlane.f32.xlu0 %v1029_v57  ;;  %v1041_v60 = vsel %vm1028_vm2, %v1024_v54, -inf }
 0x41f   : > { %1042 = vmax.xlane.f32.xlu1 %v1041_v60  ;;  %v1027_v2 = vadd.f32 %v1252_v19, %v1012_v55 }
 0x420   : > { %v1026_v61 = vadd.f32 %v1252_v19, %v1011_v59 }
 0x421   : > { %v1050_v3 = vsel %vm1028_vm2, %v1027_v2, -inf }
 0x422   : > { %1036 = vmax.xlane.f32.xlu0 %v1035_v62  ;;  %v1047_v0 = vsel %vm1028_vm2, %v1026_v61, -inf }
 0x423   : > { %1048 = vmax.xlane.f32.xlu1 %v1047_v0 }
 0x426   : > { %1045 = vmax.xlane.f32.xlu0 %v1044_v1 }
 0x42a   : > { %1051 = vmax.xlane.f32.xlu0 %v1050_v3 }
 0x4a7   : > { %v1040_v4 = vpop.xlane.xlu0 %1039  ;;  %v1034_v5 = vpop.xlane.xlu1 %1033 }
 0x4a8   : > { %v1814_v6 = vsub.f32 %v1023_v23, %v1040_v4  ;;  %v1816_v7 = vsub.f32 %v1021_v47, %v1034_v5 }
 0x4aa   : > { %v1063_v8 = vmul.f32 1.442695, %v1816_v7  ;;  %v1067_v9 = vmul.f32 1.442695, %v1814_v6 }
 0x4ab   : > { %v1031_v10 = vpop.xlane.xlu0 %1030 }
 0x4ac   : > { %v1820_v11 = vsub.f32 %v1020_v51, %v1031_v10  ;;  %v1043_v12 = vpop.xlane.xlu1 %1042  ;;  %1543 = vpow2.f32 %v1063_v8 }
 0x4ad   : > { %v1823_v15 = vsub.f32 %v1024_v54, %v1043_v12  ;;  %1545 = vpow2.f32 %v1067_v9 }
 0x4ae   : > { %v1061_v13 = vmul.f32 1.442695, %v1820_v11 }
 0x4af   : > { %v1037_v16 = vpop.xlane.xlu0 %1036  ;;  %v1069_v14 = vmul.f32 1.442695, %v1823_v15 }
 0x4b0   : > { %1547 = vpow2.f32 %v1061_v13  ;;  %v1825_v17 = vsub.f32 %v1022_v58, %v1037_v16  ;;  %v1049_v18 = vpop.xlane.xlu1 %1048 }
 0x4b1   : > { %v1829_v26 = vsub.f32 %v1026_v61, %v1049_v18 }
 0x4b2   : > { %v1065_v20 = vmul.f32 1.442695, %v1825_v17 }
 0x4b3   : > { %v1046_v27 = vpop.xlane.xlu0 %1045  ;;  %v1073_v29 = vmul.f32 1.442695, %v1829_v26 }
 0x4b4   : > { %1549 = vpow2.f32 %v1065_v20  ;;  %v1831_v28 = vsub.f32 %v1025_v63, %v1046_v27 }
 0x4b5   : > { %1551 = vpow2.f32 %v1069_v14 }
 0x4b6   : > { %v1071_v30 = vmul.f32 1.442695, %v1831_v28  ;;  %v1544_v31 = vpop.eup %1543 }
 0x4b7   : > { %v1052_v32 = vpop.xlane.xlu0 %1051  ;;  %v1080_v34 = vsel %vm1028_vm2, %v1544_v31, 0.0  ;;  %v1546_v35 = vpop.eup %1545 }
 0x4b8   : > { %1553 = vpow2.f32 %v1071_v30  ;;  %v1835_v33 = vsub.f32 %v1027_v2, %v1052_v32  ;;  %1081 = vadd.xlane.f32.xlu0 %v1080_v34  ;;  %v1086_v39 = vsel %vm1028_vm2, %v1546_v35, 0.0 }
 0x4b9   : > { %1555 = vpow2.f32 %v1073_v29 }
 0x4ba   : > { %v1548_v36 = vpop.eup %1547  ;;  %v1075_v37 = vmul.f32 1.442695, %v1835_v33 }
 0x4bb   : > { %v1077_v38 = vsel %vm1028_vm2, %v1548_v36, 0.0 }
 0x4bc   : > { %1557 = vpow2.f32 %v1075_v37  ;;  %1078 = vadd.xlane.f32.xlu1 %v1077_v38  ;;  %1087 = vadd.xlane.f32.xlu0 %v1086_v39 }
 0x4be   : > { %v1550_v40 = vpop.eup %1549 }
 0x4bf   : > { %v1083_v41 = vsel %vm1028_vm2, %v1550_v40, 0.0  ;;  %v1552_v42 = vpop.eup %1551 }
 0x4c0   : > { %1084 = vadd.xlane.f32.xlu1 %v1083_v41  ;;  %v1089_v43 = vsel %vm1028_vm2, %v1552_v42, 0.0 }
 0x4c2   : > { %v1554_v19 = vpop.eup %1553 }
 0x4c3   : > { %v1092_v21 = vsel %vm1028_vm2, %v1554_v19, 0.0  ;;  %v1556_v44 = vpop.eup %1555 }
 0x4c4   : > { %1090 = vadd.xlane.f32.xlu1 %v1089_v43  ;;  %1093 = vadd.xlane.f32.xlu0 %v1092_v21  ;;  %v1095_v22 = vsel %vm1028_vm2, %v1556_v44, 0.0 }
 0x4c6   : > { %v1558_v45 = vpop.eup %1557 }
 0x4c7   : > { %v1098_v46 = vsel %vm1028_vm2, %v1558_v45, 0.0 }
 0x4c8   : > { %1096 = vadd.xlane.f32.xlu1 %v1095_v22  ;;  %1099 = vadd.xlane.f32.xlu0 %v1098_v46 }
 0x545   : > { %v1082_v23 = vpop.xlane.xlu0 %1081 }
 0x546   : > { %1559 = vlog2.f32 %v1082_v23 }
 0x549   : > { %v1079_v47 = vpop.xlane.xlu1 %1078  ;;  %v1088_v48 = vpop.xlane.xlu0 %1087 }
 0x54a   : > { %1561 = vlog2.f32 %v1079_v47 }
 0x54b   : > { %1563 = vlog2.f32 %v1088_v48 }
 0x54d   : > { %v1085_v24 = vpop.xlane.xlu1 %1084 }
 0x54e   : > { %1565 = vlog2.f32 %v1085_v24 }
 0x550   : > { %v1560_v49 = vpop.eup %1559 }
 0x551   : > { %v1091_v25 = vpop.xlane.xlu1 %1090  ;;  %v1094_v50 = vpop.xlane.xlu0 %1093  ;;  %v1104_v51 = vmul.f32 0.6931472, %v1560_v49 }
 0x552   : > { %1567 = vlog2.f32 %v1091_v25 }
 0x553   : > { %1569 = vlog2.f32 %v1094_v50  ;;  %v1118_v53 = vsub.f32 %v1816_v7, %v1104_v51 }
 0x554   : > { %v1562_v52 = vpop.eup %1561 }
 0x555   : > { %v1564_v54 = vpop.eup %1563  ;;  %v1102_v55 = vmul.f32 0.6931472, %v1562_v52  ;;  %v1097_v56 = vpop.xlane.xlu1 %1096  ;;  %1126 = vst.msk [vmem:[%s1850_s20 + $0x8] sm:$0xff] %vm1028_vm2, %v1118_v53 }
 0x556   : > { %v1100_v57 = vpop.xlane.xlu0 %1099  ;;  %v1108_v58 = vmul.f32 0.6931472, %v1564_v54  ;;  %1571 = vlog2.f32 %v1097_v56 }
 0x557   : > { %v1117_v59 = vsub.f32 %v1820_v11, %v1102_v55  ;;  %1573 = vlog2.f32 %v1100_v57 }
 0x558   : > { %v1566_v60 = vpop.eup %1565  ;;  %v1120_v61 = vsub.f32 %v1814_v6, %v1108_v58 }
 0x559   : > { %1125 = vst.msk [vmem:[%s1850_s20] sm:$0xff] %vm1028_vm2, %v1117_v59  ;;  %v1106_v62 = vmul.f32 0.6931472, %v1566_v60 }
 0x55a   : > { %1128 = vst.msk [vmem:[%s1850_s20 + $0x18] sm:$0xff] %vm1028_vm2, %v1120_v61 }
 0x55b   : > { %v1119_v63 = vsub.f32 %v1825_v17, %v1106_v62 }
 0x55c   : > { %v1568_v0 = vpop.eup %1567 }
 0x55d   : > { %v1570_v1 = vpop.eup %1569  ;;  %1127 = vst.msk [vmem:[%s1850_s20 + $0x10] sm:$0xff] %vm1028_vm2, %v1119_v63  ;;  %v1110_v2 = vmul.f32 0.6931472, %v1568_v0 }
 0x55e   : > { %v1112_v3 = vmul.f32 0.6931472, %v1570_v1 }
 0x55f   : > { %v1121_v4 = vsub.f32 %v1823_v15, %v1110_v2 }
 0x560   : > { %v1572_v5 = vpop.eup %1571  ;;  %v1122_v6 = vsub.f32 %v1831_v28, %v1112_v3 }
 0x561   : > { %v1574_v7 = vpop.eup %1573  ;;  %1129 = vst.msk [vmem:[%s1850_s20 + $0x20] sm:$0xff] %vm1028_vm2, %v1121_v4  ;;  %v1114_v8 = vmul.f32 0.6931472, %v1572_v5 }
 0x562   : > { %1130 = vst.msk [vmem:[%s1850_s20 + $0x28] sm:$0xff] %vm1028_vm2, %v1122_v6  ;;  %v1116_v9 = vmul.f32 0.6931472, %v1574_v7 }
 0x563   : > { %v1123_v10 = vsub.f32 %v1829_v26, %v1114_v8 }
 0x564   : > { %v1124_v11 = vsub.f32 %v1835_v33, %v1116_v9 }
 0x565   : > { %1131 = vst.msk [vmem:[%s1850_s20 + $0x30] sm:$0xff] %vm1028_vm2, %v1123_v10 }
 0x566   : > { %1132 = vst.msk [vmem:[%s1850_s20 + $0x38] sm:$0xff] %vm1028_vm2, %v1124_v11 }
 0x567 PF: > { %s17_s24 = sadd.s32 1, %s1581_s24  }
 0x568   : > { %p14_p4 = scmp.ge.s32.totalorder %s17_s24, 10  }
 0x56a   :  { %16 = sbr.rel (!%p14_p4) target bundleno = 1 (0x1), region = 81 }

</bundles_post_ra>
